<compile_context>
chip_gen: v5e
topology: v5e:2x2
jax: 0.10.0
libtpu: 0.0.40
codegen_flags: <defaults>
</compile_context>

<pallas_src>
import jax
import jax.numpy as jnp
from jax.experimental import pallas as pl
from jax.experimental.pallas import tpu as pltpu


def ffn_kernel(x_ref, w1_ref, b1_ref, w2_ref, b2_ref, o_ref, acc_ref):
    """Row tile (tile_n, d_model) x d_ff chunk k:
         acc += relu(x @ W1[:, k] + b1[k]) @ W2[k, :]
       finalize (last k): o = acc + b2.
    """
    k = pl.program_id(1)

    @pl.when(k == 0)
    def _init():
        acc_ref[...] = jnp.zeros_like(acc_ref)

    # First linear chunk + ReLU (MXU matmul, f32 accumulation; ReLU on VPU).
    h = jnp.dot(x_ref[...], w1_ref[...], preferred_element_type=jnp.float32)
    h = jnp.maximum(h + b1_ref[...], 0.0)          # b1 chunk is pre-cast f32
    # Dropout == identity (eval mode).
    # Second linear chunk: cast h to the weight dtype so bf16 weights feed the
    # MXU natively; accumulate in the resident f32 scratch.
    acc_ref[...] += jnp.dot(h.astype(w2_ref.dtype), w2_ref[...],
                            preferred_element_type=jnp.float32)

    @pl.when(k == pl.num_programs(1) - 1)
    def _finalize():
        o_ref[...] = (acc_ref[...] + b2_ref[...]).astype(o_ref.dtype)


def _vmem_capacity_bytes():
    """Per-core VMEM capacity (generation-aware); conservative fallback."""
    try:
        return int(pltpu.get_tpu_info().vmem_capacity_bytes)
    except Exception:
        return 64 * 1024 * 1024        # v7x per-TensorCore size (most restrictive)


def _round_down(x, m):
    return (x // m) * m


def _round_up(x, m):
    return ((x + m - 1) // m) * m


def _choose_tiles(n, d_model, d_ff, x_itemsize, w_itemsize, row_granule):
    """Pick (tile_n, tk_ff) so the per-step VMEM footprint fits the budget."""
    budget = int(_vmem_capacity_bytes() * 0.70)    # headroom for Mosaic internals

    # d_ff chunk: full d_ff when small (single k step), else a 128-aligned chunk.
    tk_ff = d_ff if d_ff <= 2048 else 2048

    # Double-buffered streamed weight/bias chunks.
    weight_bytes = 2 * (d_model * tk_ff * w_itemsize        # W1 chunk
                        + tk_ff * d_model * w_itemsize      # W2 chunk
                        + tk_ff * 4 + d_model * 4)          # f32 bias chunks
    # Per-row bytes: double-buffered x/out tiles, f32 acc scratch,
    # f32 h chunk + its recast copy in the weight dtype.
    per_row = (2 * d_model * x_itemsize                     # x tile (2 buffers)
               + 2 * d_model * x_itemsize                   # out tile (2 buffers)
               + d_model * 4                                # acc scratch
               + tk_ff * (4 + w_itemsize))                  # h (f32) + cast copy
    avail = budget - weight_bytes
    tile_n = max(avail // per_row, row_granule) if avail > 0 else row_granule
    tile_n = min(int(tile_n), 1024)                         # diminishing returns
    if tile_n >= 256:
        tile_n = _round_down(tile_n, 256)                   # MXU-friendly M tile
    elif tile_n >= 128:
        tile_n = 128
    else:
        tile_n = max(_round_down(tile_n, row_granule), row_granule)
    return tile_n, tk_ff


def _vmem_limit_bytes(tile_n, tk_ff, d_model, x_itemsize, w_itemsize):
    """Honest footprint (double-buffered weights + I/O, scratch, h) + headroom."""
    weight_bytes = 2 * (2 * d_model * tk_ff * w_itemsize + tk_ff * 4 + d_model * 4)
    io_bytes = 2 * 2 * tile_n * d_model * x_itemsize
    acc_bytes = tile_n * d_model * 4
    h_bytes = tile_n * tk_ff * (4 + w_itemsize)
    total = int(1.3 * (weight_bytes + io_bytes + acc_bytes + h_bytes))
    cap = _vmem_capacity_bytes()
    return min(max(total, 16 * 1024 * 1024), int(cap * 0.85))


def positionwise_ffn(x, w1, b1, w2, b2, *, tile_n=None, tk_ff=None,
                     cast_to_bf16=False):
    """x: (batch, seq, d_model); w1: (d_model, d_ff); w2: (d_ff, d_model).

    Weights are stored pre-transposed relative to nn.Linear so the kernel
    computes plain row-major matmuls. Dropout is identity (eval mode).
    """
    batch, seq, d_model = x.shape
    d_ff = w1.shape[1]
    n = batch * seq
    out_dtype = x.dtype

    if cast_to_bf16:
        # bf16-native MXU feeding (v6e/v7x); accumulation stays f32 in-kernel.
        x = x.astype(jnp.bfloat16)
        w1 = w1.astype(jnp.bfloat16)
        w2 = w2.astype(jnp.bfloat16)

    x2d = x.reshape(n, d_model)
    # Pre-cast biases to f32 so the kernel does no per-step astype.
    b1_f32 = b1.reshape(1, d_ff).astype(jnp.float32)
    b2_f32 = b2.reshape(1, d_model).astype(jnp.float32)

    x_itemsize = jnp.dtype(x.dtype).itemsize
    w_itemsize = jnp.dtype(w1.dtype).itemsize
    row_granule = 16 if x_itemsize == 2 else 8      # bf16 packs 16 rows/sublane grp

    auto_tile_n, auto_tk_ff = _choose_tiles(
        n, d_model, d_ff, x_itemsize, w_itemsize, row_granule)
    if tk_ff is None:
        tk_ff = auto_tk_ff
    if tile_n is None:
        tile_n = auto_tile_n
    tile_n = max(row_granule, _round_down(int(tile_n), row_granule))
    tile_n = min(tile_n, _round_up(n, row_granule))

    # Zero-pad weights along d_ff only if the chunk doesn't divide it
    # (zero columns/rows contribute exactly zero to the accumulation).
    d_ff_pad = pl.cdiv(d_ff, tk_ff) * tk_ff
    if d_ff_pad != d_ff:
        pad = d_ff_pad - d_ff
        w1 = jnp.pad(w1, ((0, 0), (0, pad)))
        b1_f32 = jnp.pad(b1_f32, ((0, 0), (0, pad)))
        w2 = jnp.pad(w2, ((0, pad), (0, 0)))

    grid = (pl.cdiv(n, tile_n), d_ff_pad // tk_ff)   # rows parallel, k reduction last

    vmem_limit = _vmem_limit_bytes(tile_n, tk_ff, d_model, x_itemsize, w_itemsize)

    cost = pl.CostEstimate(
        flops=4 * n * d_model * d_ff,
        bytes_accessed=(2 * n * d_model * x_itemsize
                        + 2 * d_model * d_ff * w_itemsize
                        + (d_ff + d_model) * 4),
        transcendentals=0,
    )

    out2d = pl.pallas_call(
        ffn_kernel,
        out_shape=jax.ShapeDtypeStruct((n, d_model), out_dtype),
        grid_spec=pltpu.PrefetchScalarGridSpec(
            num_scalar_prefetch=0,
            grid=grid,
            in_specs=[
                # x row tile: streams over rows, reused across all k chunks.
                pl.BlockSpec((tile_n, d_model), lambda i, k: (i, 0)),
                # W1 column chunk / b1 chunk: stream over k.
                pl.BlockSpec((d_model, tk_ff), lambda i, k: (0, k)),
                pl.BlockSpec((1, tk_ff), lambda i, k: (0, k)),
                # W2 row chunk: streams over k.
                pl.BlockSpec((tk_ff, d_model), lambda i, k: (k, 0)),
                # b2: tiny, constant block index (VMEM-resident).
                pl.BlockSpec((1, d_model), lambda i, k: (0, 0)),
            ],
            out_specs=pl.BlockSpec((tile_n, d_model), lambda i, k: (i, 0)),
            scratch_shapes=[pltpu.VMEM((tile_n, d_model), jnp.float32)],
        ),
        compiler_params=pltpu.CompilerParams(
            dimension_semantics=("parallel", "arbitrary"),
            vmem_limit_bytes=vmem_limit,
        ),
        cost_estimate=cost,
    )(x2d, w1, b1_f32, w2, b2_f32)

    return out2d.reshape(batch, seq, d_model)


if __name__ == "__main__":
    # Small shapes consistent with the module. seq=60 -> n=120 rows, which is
    # NOT a multiple of the explicit tile_n=32 below, exercising the ragged
    # last-row-tile path (no jnp.pad round trip). d_ff=256 with tk_ff=128
    # exercises the chunked-d_ff accumulator (2 k steps).
    batch, seq, d_model, d_ff = 2, 60, 128, 256

    key = jax.random.PRNGKey(0)
    kx, k1, k2, k3, k4 = jax.random.split(key, 5)

    x = jax.random.normal(kx, (batch, seq, d_model), dtype=jnp.float32)
    # Deterministic parameter init (Linear-like scale), stored pre-transposed.
    w1 = jax.random.normal(k1, (d_model, d_ff), dtype=jnp.float32) / jnp.sqrt(d_model)
    b1 = jax.random.normal(k2, (d_ff,), dtype=jnp.float32) * 0.01
    w2 = jax.random.normal(k3, (d_ff, d_model), dtype=jnp.float32) / jnp.sqrt(d_ff)
    b2 = jax.random.normal(k4, (d_model,), dtype=jnp.float32) * 0.01

    # Pure-JAX reference (dropout == identity), high-precision matmuls.
    hp = jax.lax.Precision.HIGHEST
    ref = jnp.dot(jnp.maximum(jnp.dot(x, w1, precision=hp) + b1, 0.0),
                  w2, precision=hp) + b2

    # f32 path: explicit small tiles -> 4 row tiles (last one ragged) x 2 d_ff chunks.
    # Tolerance covers MXU default-precision f32 matmul emulation; structural
    # bugs (wrong chunk indexing / bias / accumulation) produce O(1) errors.
    out = positionwise_ffn(x, w1, b1, w2, b2, tile_n=32, tk_ff=128)
    out = jax.block_until_ready(out)
    assert out.shape == (batch, seq, d_model)
    assert jnp.allclose(out, ref, atol=2e-2, rtol=2e-2)

    # bf16 MXU-feeding path with auto (VMEM-budget-derived) tiles; looser tolerance.
    out_bf16 = positionwise_ffn(x, w1, b1, w2, b2, cast_to_bf16=True)
    out_bf16 = jax.block_until_ready(out_bf16)
    assert out_bf16.shape == (batch, seq, d_model)
    assert jnp.allclose(out_bf16, ref, atol=1.5e-1, rtol=1.5e-1)

    print("KERNEL_OK")
</pallas_src>

<mosaic_0001>
module attributes {stable_mosaic.version = 11 : i64} {
  func.func @ffn_kernel(%arg0: i32, %arg1: i32, %arg2: memref<32x128xf32, #tpu.memory_space<vmem>>, %arg3: memref<128x128xf32, #tpu.memory_space<vmem>>, %arg4: memref<1x128xf32, #tpu.memory_space<vmem>>, %arg5: memref<128x128xf32, #tpu.memory_space<vmem>>, %arg6: memref<1x128xf32, #tpu.memory_space<vmem>>, %arg7: memref<32x128xf32, #tpu.memory_space<vmem>>, %arg8: memref<32x128xf32, #tpu.memory_space<vmem>>) attributes {dimension_semantics = [#tpu.dimension_semantics<parallel>, #tpu.dimension_semantics<arbitrary>], iteration_bounds = array<i64: 4, 2>, scalar_prefetch = 0 : i64, scratch_operands = 1 : i64, tpu.core_type = #tpu.core_type<tc>, window_params = [{transform_indices = @transform_0, window_bounds = array<i64: 32, 128>}, {transform_indices = @transform_1, window_bounds = array<i64: 128, 128>}, {transform_indices = @transform_2, window_bounds = array<i64: 1, 128>}, {transform_indices = @transform_3, window_bounds = array<i64: 128, 128>}, {pipeline_mode = #tpu.pipeline_mode<synchronous>, transform_indices = @transform_4, window_bounds = array<i64: 1, 128>}, {transform_indices = @transform_5, window_bounds = array<i64: 32, 128>}]} {
    %c0_i32 = arith.constant 0 : i32
    %0 = arith.cmpi eq, %arg1, %c0_i32 : i32
    %1 = arith.extui %0 : i1 to i32
    %c0_i32_0 = arith.constant 0 : i32
    %2 = arith.cmpi ne, %1, %c0_i32_0 : i32
    scf.if %2 {
      %cst_15 = arith.constant 0.000000e+00 : f32
      %19 = vector.broadcast %cst_15 : f32 to vector<32x128xf32>
      %c0_16 = arith.constant 0 : index
      %c0_17 = arith.constant 0 : index
      %20 = vector.load %arg8[%c0_16, %c0_17] : memref<32x128xf32, #tpu.memory_space<vmem>>, vector<32x128xf32>
      tpu.vector_store %arg8[%c0_16, %c0_17], %19 {strides = array<i32>} : memref<32x128xf32, #tpu.memory_space<vmem>>, vector<32x128xf32>,
    } else {
    }
    %c0 = arith.constant 0 : index
    %c0_1 = arith.constant 0 : index
    %3 = vector.load %arg2[%c0, %c0_1] : memref<32x128xf32, #tpu.memory_space<vmem>>, vector<32x128xf32>
    %c0_2 = arith.constant 0 : index
    %c0_3 = arith.constant 0 : index
    %4 = vector.load %arg3[%c0_2, %c0_3] : memref<128x128xf32, #tpu.memory_space<vmem>>, vector<128x128xf32>
    %cst = arith.constant dense<0.000000e+00> : vector<32x128xf32>
    %5 = tpu.matmul %3, %4, %cst {dimension_numbers = #tpu.dot_dimension_numbers<[1], [0], [0], [1], [0, 0, 1, 1], [], []>} : vector<32x128xf32>, vector<128x128xf32>, vector<32x128xf32> -> vector<32x128xf32>
    %c0_4 = arith.constant 0 : index
    %c0_5 = arith.constant 0 : index
    %6 = vector.load %arg4[%c0_4, %c0_5] : memref<1x128xf32, #tpu.memory_space<vmem>>, vector<1x128xf32>
    %7 = vector.broadcast %6 : vector<1x128xf32> to vector<32x128xf32>
    %8 = arith.addf %5, %7 : vector<32x128xf32>
    %cst_6 = arith.constant 0.000000e+00 : f32
    %9 = vector.broadcast %cst_6 : f32 to vector<32x128xf32>
    %10 = arith.maximumf %8, %9 : vector<32x128xf32>
    %c0_7 = arith.constant 0 : index
    %c0_8 = arith.constant 0 : index
    %11 = vector.load %arg8[%c0_7, %c0_8] : memref<32x128xf32, #tpu.memory_space<vmem>>, vector<32x128xf32>
    %c0_9 = arith.constant 0 : index
    %c0_10 = arith.constant 0 : index
    %12 = vector.load %arg5[%c0_9, %c0_10] : memref<128x128xf32, #tpu.memory_space<vmem>>, vector<128x128xf32>
    %cst_11 = arith.constant dense<0.000000e+00> : vector<32x128xf32>
    %13 = tpu.matmul %10, %12, %cst_11 {dimension_numbers = #tpu.dot_dimension_numbers<[1], [0], [0], [1], [0, 0, 1, 1], [], []>} : vector<32x128xf32>, vector<128x128xf32>, vector<32x128xf32> -> vector<32x128xf32>
    %14 = arith.addf %11, %13 : vector<32x128xf32>
    %c0_12 = arith.constant 0 : index
    %c0_13 = arith.constant 0 : index
    %15 = vector.load %arg8[%c0_12, %c0_13] : memref<32x128xf32, #tpu.memory_space<vmem>>, vector<32x128xf32>
    tpu.vector_store %arg8[%c0_12, %c0_13], %14 {strides = array<i32>} : memref<32x128xf32, #tpu.memory_space<vmem>>, vector<32x128xf32>,
    %c1_i32 = arith.constant 1 : i32
    %16 = arith.cmpi eq, %arg1, %c1_i32 : i32
    %17 = arith.extui %16 : i1 to i32
    %c0_i32_14 = arith.constant 0 : i32
    %18 = arith.cmpi ne, %17, %c0_i32_14 : i32
    scf.if %18 {
      %c0_15 = arith.constant 0 : index
      %c0_16 = arith.constant 0 : index
      %19 = vector.load %arg8[%c0_15, %c0_16] : memref<32x128xf32, #tpu.memory_space<vmem>>, vector<32x128xf32>
      %c0_17 = arith.constant 0 : index
      %c0_18 = arith.constant 0 : index
      %20 = vector.load %arg6[%c0_17, %c0_18] : memref<1x128xf32, #tpu.memory_space<vmem>>, vector<1x128xf32>
      %21 = vector.broadcast %20 : vector<1x128xf32> to vector<32x128xf32>
      %22 = arith.addf %19, %21 : vector<32x128xf32>
      %c0_19 = arith.constant 0 : index
      %c0_20 = arith.constant 0 : index
      %23 = vector.load %arg7[%c0_19, %c0_20] : memref<32x128xf32, #tpu.memory_space<vmem>>, vector<32x128xf32>
      tpu.vector_store %arg7[%c0_19, %c0_20], %22 {strides = array<i32>} : memref<32x128xf32, #tpu.memory_space<vmem>>, vector<32x128xf32>,
    } else {
    }
    return
  }
  func.func @transform_0(%arg0: i32, %arg1: i32) -> (i32, i32) {
    %c0_i32 = arith.constant 0 : i32
    %c0_i32_0 = arith.constant 0 : i32
    return %arg0, %c0_i32 : i32, i32
  }
  func.func @transform_1(%arg0: i32, %arg1: i32) -> (i32, i32) {
    %c0_i32 = arith.constant 0 : i32
    %c0_i32_0 = arith.constant 0 : i32
    return %c0_i32, %arg1 : i32, i32
  }
  func.func @transform_2(%arg0: i32, %arg1: i32) -> (i32, i32) {
    %c0_i32 = arith.constant 0 : i32
    %c0_i32_0 = arith.constant 0 : i32
    return %c0_i32, %arg1 : i32, i32
  }
  func.func @transform_3(%arg0: i32, %arg1: i32) -> (i32, i32) {
    %c0_i32 = arith.constant 0 : i32
    %c0_i32_0 = arith.constant 0 : i32
    return %arg1, %c0_i32 : i32, i32
  }
  func.func @transform_4(%arg0: i32, %arg1: i32) -> (i32, i32) {
    %c0_i32 = arith.constant 0 : i32
    %c0_i32_0 = arith.constant 0 : i32
    %c0_i32_1 = arith.constant 0 : i32
    return %c0_i32, %c0_i32_0 : i32, i32
  }
  func.func @transform_5(%arg0: i32, %arg1: i32) -> (i32, i32) {
    %c0_i32 = arith.constant 0 : i32
    %c0_i32_0 = arith.constant 0 : i32
    return %arg0, %c0_i32 : i32, i32
  }
}

</mosaic_0001>

<bundles_post_ra>
// kernel: tpu_custom_call.1
= control target key start
LH: loop header
LB: loop body
LE: loop exit
PB: predicated region body
PF: predicated region fallthrough
CT: control target
= control target key end

     0   :  { %s1551_s0 = inlined_call_operand.hbm [shape: f32[120,128], index: 0, kind: input, shape index: {}]   ;;  %s1552_s1 = inlined_call_operand.hbm [shape: f32[128,256], index: 1, kind: input, shape index: {}]   ;;  %s1553_s2 = inlined_call_operand.hbm [shape: f32[1,256], index: 2, kind: input, shape index: {}]   ;;  %s1554_s3 = inlined_call_operand.hbm [shape: f32[256,128], index: 3, kind: input, shape index: {}]   ;;  %s1555_s4 = inlined_call_operand.vmem [shape: f32[1,128], index: 4, kind: input, shape index: {}]   ;;  %s1556_s5 = inlined_call_operand.hbm [shape: f32[120,128], index: 5, kind: output, shape index: {}]  }
   0x1   :  { %1569 = sst [smem:[#allocation27_spill]] %s1551_s0 }
   0x2   :  { %1570 = sst [smem:[#allocation28_spill]] %s1552_s1 }
   0x3   :  { %1571 = sst [smem:[#allocation29_spill]] %s1555_s4 }
   0x4   :  { %1572 = sst [smem:[#allocation30_spill]] %s1556_s5 }
   0x5   :  { %10 = vsyncpa [#allocation4], 0 }
   0x6   :  { %12 = vsyncpa [#allocation4 + $0x1], 0 }
   0x7   :  { %13 = vsyncpa [#allocation7], 0 }
   0x8   :  { %15 = vsyncpa [#allocation7 + $0x1], 0 }
   0x9   :  { %16 = vsyncpa [#allocation10], 0 }
   0xa   :  { %18 = vsyncpa [#allocation10 + $0x1], 0 }
   0xb   :  { %19 = vsyncpa [#allocation5], 0 }
   0xc   :  { %21 = vsyncpa [#allocation5 + $0x1], 0  ;;  %s1185_s18 = smov 0   ;;  %s1187_s19 = smov 0  }
   0xd   :  { %s1189_s20 = smov 0   ;;  %s1191_s21 = smov 0  }
   0xe   :  { %s1193_s22 = smov 0   ;;  %s1195_s23 = smov 0  }
   0xf   :  { %s1197_s24 = smov 0   ;;  %s1199_s25 = smov 0  }
  0x10   :  { %s1201_s26 = smov 0   ;;  %s1203_s27 = smov 0  }
  0x11   :  { %s1205_s28 = smov 0  }
  0x12 LB: > { %1573 = sst [smem:[#allocation16_spill]] %s1111_s20  ;;  %s1241_s29 = sadd.s32 4294967295, %s1143_s28   ;;  %s1143_s28 = sphi %s1205_s28, %s27_s28   ;;  %s1139_s27 = sphi %s1203_s27, %s1608_s27   ;;  %s1135_s26 = sphi %s1201_s26, %s1614_s26   ;;  %s1131_s25 = sphi %s1199_s25, %s1606_s25   ;;  %s1127_s24 = sphi %s1197_s24, %s1613_s24   ;;  %s1123_s23 = sphi %s1195_s23, %s1605_s23   ;;  %s1119_s22 = sphi %s1193_s22, %s1612_s22   ;;  %s1115_s21 = sphi %s1191_s21, %s1611_s21   ;;  %s1111_s20 = sphi %s1189_s20, %s1603_s20   ;;  %s1107_s19 = sphi %s1187_s19, %s1610_s19   ;;  %s1103_s18 = sphi %s1185_s18, %s1609_s18  }
  0x13   : > { %1574 = sst [smem:[#allocation17_spill]] %s1115_s21  ;;  %s702_s30 = sadd.s32 4294967294, %s1143_s28  }
  0x14   : > { %1575 = sst [smem:[#allocation18_spill]] %s1123_s23  ;;  %s36_s6 = sadd.s32 1, %s1135_s26 }
  0x15   : > { %1576 = sst [smem:[#allocation19_spill]] %s1131_s25  ;;  %s39_s7 = sadd.s32 1, %s1139_s27 }
  0x16   : > { %1577 = sst [smem:[#allocation20_spill]] %s1139_s27  ;;  %p37_p0 = scmp.ge.s32.totalorder %s36_s6, 2 }
  0x17   : > { %s46_s8 = sadd.s32 1, %s1123_s23  ;;  %p53_p1 = scmp.ne.s32.totalorder %s1123_s23, %s1119_s22 }
  0x18   : > { %p54_p2 = scmp.eq.s32.totalorder %s1143_s28, 0  ;;  %s1616_s6 = smov (%p37_p0, %s36_s6), 0 }
  0x19   : > { %1578 = sst [smem:[#allocation21_spill]] %s1616_s6  ;;  %s1618_s7 = smov (!%p37_p0, %s39_s7), %s1139_s27 }
  0x1a   : > { %p1258_p3 = por %p54_p2, %p53_p1  ;;  %p1557_p4 = scmp.ne.s32.totalorder %s1119_s22, %s1115_s21 }
  0x1b   : > { %p41_p5 = scmp.ge.s32.totalorder %s1618_s7, 4  ;;  %p60_p6 = scmp.eq.s32.totalorder %s1241_s29, 0 }
  0x1c   : > { %s69_s10 = ssub.s32 %s1135_s26, %s1616_s6  ;;  %s72_s11 = sadd.s32 1, %s1111_s20 }
  0x1d   : > { %s1620_s7 = smov (%p41_p5, %s1618_s7), 0  ;;  %p1275_p7 = por %p60_p6, %p1557_p4 }
  0x1e   : > { %1580 = sst [smem:[#allocation22_spill]] %s1620_s7  ;;  %p70_p8 = scmp.eq.s32.totalorder %s69_s10, 0 }
  0x1f   : > { %s43_s13 = ssub.s32 %s1139_s27, %s1620_s7  ;;  %p79_p9 = scmp.ne.s32.totalorder %s1111_s20, %s1107_s19 }
  0x20   : > { %p44_p10 = scmp.eq.s32.totalorder %s43_s13, 0  ;;  %p85_p11 = scmp.ne.s32.totalorder %s1107_s19, %s1103_s18 }
  0x21   : > { %s1286_s14 = scalar_select %p70_p8, %s1111_s20, %s72_s11  }
  0x22   : > { %s1289_s15 = scalar_select %p44_p10, %s1123_s23, %s46_s8  }
  0x23   : > { %1582 = sst [smem:[#allocation23_spill]] %s1286_s14  ;;  %p1293_p12 = por %p79_p9, %p54_p2 }
  0x24   : > { %1583 = sst [smem:[#allocation24_spill]] %s1289_s15  ;;  %p1299_p13 = por %p85_p11, %p60_p6 }
  0x25   : > { %p182_p0 = scmp.eq.s32.totalorder %s1241_s29, 7  ;;  %p188_p5 = scmp.eq.s32.totalorder %s702_s30, 7 }
  0x26   : > { %p1588_p8 = scmp.ne.s32.totalorder %s1119_s22, %s1115_s21  ;;  %p704_p2 = scmp.ge.s32.totalorder %s1143_s28, 8 }
  0x27   : > { %p1307_p4 = por %p182_p0, %p53_p1 }
  0x28   : > { %p1314_p10 = por %p188_p5, %p1588_p8  ;;  %207 = sbr.rel (%p704_p2) target bundleno = 103 (0x67), region = 20 }
  0x29   : > { %s1586_s10 = scalar_select %p1307_p4, 1, 0 }
  0x2a   : > { %s1589_s18 = scalar_select %p1314_p10, 1, 0 }
  0x2b   : > { %1587 = sst [smem:[#allocation25_spill]] %s1586_s10 }
  0x2c   : > { %1590 = sst [smem:[#allocation26_spill]] %s1589_s18 }
  0x2d   : > { %210 = sbr.rel (!%p1258_p3) target bundleno = 88 (0x58), region = 24  ;;  %s211_s8 = sand.u32 (%p1258_p3), 1, %s1123_s23  }
  0x2e   : > { %s706_s30 = sshll.u32 (%p1258_p3), %s1139_s27, 2  ;;  %s705_s11 = sshll.u32 (%p1258_p3), %s211_s8, 5 }
  0x2f   : > { %s217_s13 = ssub.s32 (%p1258_p3), 15, %s706_s30  ;;  %s1326_s14 = scalar_lea.sflag (%p1258_p3), [#allocation4], %s211_s8 }
  0x30   : > { %p218_p1 = scmp.lt.s32.totalorder (%p1258_p3), %s217_s13, 4  ;;  %s215_s18 = scalar_lea.vmem (%p1258_p3), [#allocation3], %s705_s11 }
  0x32   : > { %s1622_s13 = smov (!%p218_p1, %s217_s13), 4 }
  0x33   : > { %s707_s7 = sshll.u32 %s1622_s13, 3 }
  0x34   : > { %s221_s6 = ssub.s32 32, %s707_s7 }
  0x35   : > { %s222_s15 = sshll.u32 %s221_s6, 4 }
  0x36   : > { %223 = vsyncadd %s1326_s14, %s222_s15  ;;  %p1329_p3 = scmp.ne.s32.totalorder %s707_s7, 0  ;;  %s733_s30 = sshll.u32 %s1139_s27, 5 }
  0x37   : > { %s1592_s0 = sld [smem:[#allocation27_spill]]  ;;  %s1337_s25 = sshll.u32 %s215_s18, 4  ;;  %s231_s25 = int_to_ptr.vmem [resolvable:$true] %s1337_s25 }
  0x38   : > { %s1565_s15 = sshll.u32 %s1622_s13, 7 }
  0x39   : > { %s881_s7 = sshrl.u32 %s1565_s15, 4 }
  0x3d   : > { %s226_s5 = scalar_lea.hbm %s1592_s0, %s733_s30  ;;  %s890_s18 = scalar_lea.hbm %s1592_s0, 120 }
  0x3e   : > { %s228_s6 = sshll.u32 %s226_s5, 4  ;;  %s1340_s6 = int_to_ptr.hbm [resolvable:$true] %s228_s6 }
  0x3f   : > { %s879_s8 = sshra.s32 %s1340_s6, 4  ;;  %s880_s8 = int_to_ptr.hbm [resolvable:$true] %s879_s8 }
  0x40   : > { %s886_s11 = scalar_lea.hbm %s880_s8, %s881_s7 }
  0x41   : > { %p887_p6 = scmp.ne.s32.totalorder %s880_s8, %s886_s11  ;;  %p892_p0 = scmp.lt.s32.totalorder %s890_s18, %s886_s11 }
  0x43   : > { %p888_p9 = pnand %p887_p6, %p1329_p3 }
  0x45   : > { %p889_p11 = pneg %p888_p9 }
  0x47   : > { %p894_p5 = pnand %p892_p0, %p889_p11 }
  0x49   : > { %897 = shalt.err (!%p894_p5)
}
  0x4a   : > { %s898_s5 = sshra.s32 %s231_s25, 4  ;;  %s1145_s8 = smov [#allocation3]   ;;  %s899_s5 = int_to_ptr.vmem [resolvable:$true] %s898_s5 }
  0x4b   : > { %s905_s30 = scalar_lea.vmem %s899_s5, %s881_s7  ;;  %s909_s15 = scalar_lea.vmem %s1145_s8, 64 }
  0x4c   : > { %p906_p8 = scmp.ne.s32.totalorder %s899_s5, %s905_s30  ;;  %p911_p6 = scmp.lt.s32.totalorder %s909_s15, %s905_s30 }
  0x4e   : > { %p907_p2 = pnand %p906_p8, %p1329_p3 }
  0x50   : > { %p908_p1 = pneg %p907_p2 }
  0x52   : > { %p913_p9 = pnand %p911_p6, %p908_p1 }
  0x54   : > { %916 = shalt.err (!%p913_p9)
}
  0x55   : > { %s1146_s21 = smov 128   ;;  %s1147_s11 = smov 8  }
  0x56   : > { %s1593_s23 = sshll.u32 %s1622_s13, 7 }
  0x57   : > { %236 = dma.hbm_to_vmem [thread:$0]  (%p1329_p3), %s1340_s6, %s1593_s23, %s231_s25, %s1326_s14, %s1146_s21, %s1146_s21, %s1147_s11  }
  0x58 PF: > { %s240_s15 = sand.u32 1, %s1143_s28   ;;  %s1365_s7 = sand.u32 1, %s1111_s20  }
  0x59   : > { %s712_s18 = sshll.u32 %s1365_s7, 7  ;;  %s713_s5 = sshll.u32 %s1135_s26, 3 }
  0x5a   : > { %s1594_s1 = sld [smem:[#allocation28_spill]]  ;;  %s244_s0 = scalar_lea.vmem [#allocation6], %s712_s18 }
  0x5b   : > { %s251_s25 = sshll.u32 %s244_s0, 4  ;;  %s241_s13 = scalar_lea.sflag [#allocation7], %s240_s15  ;;  %s252_s25 = int_to_ptr.vmem [resolvable:$true] %s251_s25 }
  0x5c   : > { %s1148_s6 = smov 256   ;;  %s1149_s21 = smov 128  }
  0x5d   : > { %s1150_s11 = smov 8   ;;  %s267_s30 = scalar_lea.hbm %s1553_s2, %s1135_s26 }
  0x5e   : > { %s264_s8 = scalar_lea.vmem [#allocation8], %s1365_s7  ;;  %s734_s0 = sshll.u32 %s1135_s26, 7 }
  0x5f   : > { %s282_s15 = scalar_lea.vmem [#allocation9], %s712_s18  ;;  %s287_s4 = scalar_lea.hbm %s1554_s3, %s734_s0 }
  0x60   : > { %s248_s9 = scalar_lea.hbm %s1594_s1, %s713_s5  ;;  %s269_s5 = sshll.u32 %s267_s30, 4  ;;  %s270_s5 = int_to_ptr.hbm [resolvable:$true] %s269_s5 }
  0x61   : > { %s249_s14 = sshll.u32 %s248_s9, 4  ;;  %s271_s1 = sshll.u32 %s264_s8, 4  ;;  %s250_s14 = int_to_ptr.hbm [resolvable:$true] %s249_s14  ;;  %s272_s1 = int_to_ptr.vmem [resolvable:$true] %s271_s1 }
  0x62   : > { %768 = dma.hbm_to_vmem [thread:$0]  (%p1293_p12), %s250_s14, 2048, %s252_s25, %s241_s13, %s1148_s6, %s1149_s21, %s1150_s11  }
  0x63   : > { %769 = dma.hbm_to_vmem [thread:$0]  (%p1293_p12), %s270_s5, 16, %s272_s1, %s241_s13  }
  0x64   : > { %s290_s9 = sshll.u32 %s282_s15, 4  ;;  %s288_s25 = sshll.u32 %s287_s4, 4  ;;  %s291_s9 = int_to_ptr.vmem [resolvable:$true] %s290_s9  ;;  %s289_s25 = int_to_ptr.hbm [resolvable:$true] %s288_s25 }
  0x65   : > { %s279_s27 = scalar_lea.sflag [#allocation10], %s1365_s7 }
  0x66   : > { %770 = dma.hbm_to_vmem [thread:$0]  (%p1293_p12), %s289_s25, 2048, %s291_s9, %s279_s27, %s1149_s21, %s1149_s21, %s1150_s11  }
  0x67 PF: > { %p717_p3 = scmp.ge.s32.totalorder %s1143_s28, 1  ;;  %p298_p11 = scmp.lt.s32.totalorder %s1143_s28, 9 }
  0x69   : > { %p299_p0 = pnand %p717_p3, %p298_p11 }
  0x6a   : > { %s1391_s1 = sand.u32 (!%p299_p0), 1, %s1119_s22  }
  0x6b   : > { %302 = sbr.rel (%p299_p0) target bundleno = 495 (0x1ef), region = 40  ;;  %s718_s20 = sshll.u32 (!%p299_p0), %s1391_s1, 5 }
  0x6c   : > { %s305_s10 = scalar_lea.sflag (!%p299_p0), [#allocation4], %s1391_s1  ;;  %s1395_s4 = scalar_lea.vmem (!%p299_p0), [#allocation3], %s718_s20 }
  0x70   : > { %1086 = dma.done.wait (%p1275_p7), %s305_s10, 512  }
  0x71   : > { %1088 = vsyncadd (%p1275_p7), %s305_s10, 4294966784  ;;  %s314_s16 = sand.u32 1, %s1241_s29   ;;  %s1403_s7 = sand.u32 1, %s1107_s19  }
  0x72   : > { %s719_s18 = sshll.u32 %s1403_s7, 7  ;;  %s315_s14 = scalar_lea.sflag [#allocation7], %s314_s16 }
  0x73   : > { %s1406_s13 = scalar_lea.vmem [#allocation6], %s719_s18 }
  0x74   : > { %1090 = dma.done.wait (%p1299_p13), %s315_s14, 2064  }
  0x75   : > { %1092 = vsyncadd (%p1299_p13), %s315_s14, 4294965232  ;;  %s327_s12 = scalar_lea.vmem [#allocation8], %s1403_s7  ;;  %s334_s6 = scalar_lea.sflag [#allocation10], %s1403_s7 }
  0x76   : > { %s1414_s21 = scalar_lea.vmem [#allocation9], %s719_s18 }
  0x77   : > { %1094 = dma.done.wait (%p1299_p13), %s334_s6, 2048  }
  0x78   : > { %1096 = vsyncadd (%p1299_p13), %s334_s6, 4294965248  ;;  %s1420_s29 = scalar_lea.vmem [#allocation11], %s718_s20  ;;  %p722_p7 = scmp.ne.s32.totalorder %s1127_s24, 0 }
  0x7a   : > { %393 = sbr.rel (%p722_p7) target bundleno = 132 (0x84), region = 60 }
  0x7f   : > { %v1151_v0 = vmov 0.0  }
  0x80   : > { %394 = vst [vmem:[#allocation2 + $0x10] sm:$0xff] %v1151_v0 }
  0x81   : > { %395 = vst [vmem:[#allocation2] sm:$0xff] %v1151_v0 }
  0x82   : > { %396 = vst [vmem:[#allocation2 + $0x18] sm:$0xff] %v1151_v0 }
  0x83   : > { %397 = vst [vmem:[#allocation2 + $0x8] sm:$0xff] %v1151_v0 }
  0x84 PF: > { %v417_v1 = vld [vmem:[%s1406_s13 + $0x78] sm:$0xff]  ;;  %v416_v2 = vld [vmem:[%s1406_s13 + $0x70] sm:$0xff]  ;;  %v415_v3 = vld [vmem:[%s1406_s13 + $0x68] sm:$0xff]  ;;  %p723_p12 = scmp.ne.s32.totalorder %s1127_s24, 1 }
  0x85   : > { %736 = vmatpush.msra.mxu2 %v417_v1  ;;  %422 = vmatpush.msra.mxu0 %v417_v1  ;;  %v414_v4 = vld [vmem:[%s1406_s13 + $0x60] sm:$0xff]  ;;  %v413_v5 = vld [vmem:[%s1406_s13 + $0x58] sm:$0xff]  ;;  %v412_v6 = vld [vmem:[%s1406_s13 + $0x50] sm:$0xff]  ;;  %s1595_s23 = sld [smem:[#allocation29_spill]] (!%p723_p12) }
  0x86   : > { %v474_v7 = vld [vmem:[%s1414_s21 + $0x78] sm:$0xff]  ;;  %v473_v8 = vld [vmem:[%s1414_s21 + $0x70] sm:$0xff]  ;;  %v411_v9 = vld [vmem:[%s1406_s13 + $0x48] sm:$0xff] }
  0x87   : > { %737 = vmatpush.msra.mxu2 %v416_v2  ;;  %423 = vmatpush.msra.mxu0 %v416_v2  ;;  %v472_v10 = vld [vmem:[%s1414_s21 + $0x68] sm:$0xff]  ;;  %v410_v11 = vld [vmem:[%s1406_s13 + $0x40] sm:$0xff]  ;;  %v409_v13 = vld [vmem:[%s1406_s13 + $0x38] sm:$0xff] }
  0x88   : > { %752 = vmatpush.msra.mxu3 %v474_v7  ;;  %475 = vmatpush.msra.mxu1 %v474_v7  ;;  %v471_v12 = vld [vmem:[%s1414_s21 + $0x60] sm:$0xff]  ;;  %v470_v14 = vld [vmem:[%s1414_s21 + $0x58] sm:$0xff]  ;;  %v408_v15 = vld [vmem:[%s1406_s13 + $0x30] sm:$0xff] }
  0x89   : > { %738 = vmatpush.msra.mxu2 %v415_v3  ;;  %424 = vmatpush.msra.mxu0 %v415_v3  ;;  %v469_v16 = vld [vmem:[%s1414_s21 + $0x50] sm:$0xff]  ;;  %v407_v17 = vld [vmem:[%s1406_s13 + $0x28] sm:$0xff]  ;;  %v406_v19 = vld [vmem:[%s1406_s13 + $0x20] sm:$0xff] }
  0x8a   : > { %753 = vmatpush.msra.mxu3 %v473_v8  ;;  %476 = vmatpush.msra.mxu1 %v473_v8  ;;  %v468_v18 = vld [vmem:[%s1414_s21 + $0x48] sm:$0xff]  ;;  %v467_v20 = vld [vmem:[%s1414_s21 + $0x40] sm:$0xff]  ;;  %v405_v21 = vld [vmem:[%s1406_s13 + $0x18] sm:$0xff] }
  0x8b   : > { %739 = vmatpush.msra.mxu2 %v414_v4  ;;  %425 = vmatpush.msra.mxu0 %v414_v4  ;;  %v466_v22 = vld [vmem:[%s1414_s21 + $0x38] sm:$0xff]  ;;  %v404_v23 = vld [vmem:[%s1406_s13 + $0x10] sm:$0xff]  ;;  %v403_v25 = vld [vmem:[%s1406_s13 + $0x8] sm:$0xff] }
  0x8c   : > { %754 = vmatpush.msra.mxu3 %v472_v10  ;;  %477 = vmatpush.msra.mxu1 %v472_v10  ;;  %v465_v24 = vld [vmem:[%s1414_s21 + $0x30] sm:$0xff]  ;;  %v464_v26 = vld [vmem:[%s1414_s21 + $0x28] sm:$0xff]  ;;  %v402_v27 = vld [vmem:[%s1406_s13] sm:$0xff] }
  0x8d   : > { %740 = vmatpush.msra.mxu2 %v413_v5  ;;  %426 = vmatpush.msra.mxu0 %v413_v5  ;;  %v400_v28 = vld [vmem:[%s1395_s4 + $0x10] sm:$0xff]  ;;  %v398_v29 = vld [vmem:[%s1395_s4] sm:$0xff]  ;;  %v401_v32 = vld [vmem:[%s1395_s4 + $0x18] sm:$0xff] }
  0x8e   : > { %755 = vmatpush.msra.mxu3 %v471_v12  ;;  %478 = vmatpush.msra.mxu1 %v471_v12  ;;  %v463_v30 = vld [vmem:[%s1414_s21 + $0x20] sm:$0xff]  ;;  %v462_v31 = vld [vmem:[%s1414_s21 + $0x18] sm:$0xff]  ;;  %v461_v34 = vld [vmem:[%s1414_s21 + $0x10] sm:$0xff] }
  0x8f   : > { %741 = vmatpush.msra.mxu2 %v412_v6  ;;  %427 = vmatpush.msra.mxu0 %v412_v6  ;;  %v399_v33 = vld [vmem:[%s1395_s4 + $0x8] sm:$0xff]  ;;  %v877_v37 = vld [vmem:[%s327_s12] ss:$0 sm:$0xff]  ;;  %v455_v50 = vld [vmem:[#allocation2 + $0x10] sm:$0xff] }
  0x90   : > { %756 = vmatpush.msra.mxu3 %v470_v14  ;;  %479 = vmatpush.msra.mxu1 %v470_v14  ;;  %v460_v35 = vld [vmem:[%s1414_s21 + $0x8] sm:$0xff]  ;;  %v459_v36 = vld [vmem:[%s1414_s21] sm:$0xff]  ;;  %v457_v56 = vld [vmem:[#allocation2 + $0x18] sm:$0xff] }
  0x91   : > { %742 = vmatpush.msra.mxu2 %v411_v9  ;;  %428 = vmatpush.msra.mxu0 %v411_v9  ;;  %v456_v53 = vld [vmem:[#allocation2] sm:$0xff]  ;;  %v458_v59 = vld [vmem:[#allocation2 + $0x8] sm:$0xff] }
  0x92   : > { %757 = vmatpush.msra.mxu3 %v469_v16  ;;  %480 = vmatpush.msra.mxu1 %v469_v16 }
  0x93   : > { %743 = vmatpush.msra.mxu2 %v410_v11  ;;  %429 = vmatpush.msra.mxu0 %v410_v11 }
  0x94   : > { %758 = vmatpush.msra.mxu3 %v468_v18  ;;  %481 = vmatpush.msra.mxu1 %v468_v18 }
  0x95   : > { %744 = vmatpush.msra.mxu2 %v409_v13  ;;  %430 = vmatpush.msra.mxu0 %v409_v13 }
  0x96   : > { %759 = vmatpush.msra.mxu3 %v467_v20  ;;  %482 = vmatpush.msra.mxu1 %v467_v20 }
  0x97   : > { %745 = vmatpush.msra.mxu2 %v408_v15  ;;  %431 = vmatpush.msra.mxu0 %v408_v15 }
  0x98   : > { %760 = vmatpush.msra.mxu3 %v466_v22  ;;  %483 = vmatpush.msra.mxu1 %v466_v22 }
  0x99   : > { %746 = vmatpush.msra.mxu2 %v407_v17  ;;  %432 = vmatpush.msra.mxu0 %v407_v17 }
  0x9a   : > { %761 = vmatpush.msra.mxu3 %v465_v24  ;;  %484 = vmatpush.msra.mxu1 %v465_v24 }
  0x9b   : > { %747 = vmatpush.msra.mxu2 %v406_v19  ;;  %433 = vmatpush.msra.mxu0 %v406_v19 }
  0x9c   : > { %762 = vmatpush.msra.mxu3 %v464_v26  ;;  %485 = vmatpush.msra.mxu1 %v464_v26 }
  0x9d   : > { %748 = vmatpush.msra.mxu2 %v405_v21  ;;  %434 = vmatpush.msra.mxu0 %v405_v21 }
  0x9e   : > { %763 = vmatpush.msra.mxu3 %v463_v30  ;;  %486 = vmatpush.msra.mxu1 %v463_v30 }
  0x9f   : > { %749 = vmatpush.msra.mxu2 %v404_v23  ;;  %435 = vmatpush.msra.mxu0 %v404_v23 }
  0xa0   : > { %764 = vmatpush.msra.mxu3 %v462_v31  ;;  %487 = vmatpush.msra.mxu1 %v462_v31 }
  0xa1   : > { %750 = vmatpush.msra.mxu2 %v403_v25  ;;  %436 = vmatpush.msra.mxu0 %v403_v25 }
  0xa2   : > { %765 = vmatpush.msra.mxu3 %v461_v34  ;;  %488 = vmatpush.msra.mxu1 %v461_v34 }
  0xa3   : > { %751 = vmatpush.msra.mxu2 %v402_v27  ;;  %437 = vmatpush.msra.mxu0 %v402_v27 }
  0xa4   : > { %444 = vmatmul.f32.vlgmr.msra.gmra.mxu2 %v400_v28  ;;  %438 = vmatmul.f32.vlgmr.msra.gmra.mxu0 %v398_v29 }
  0xa5   : > { %766 = vmatpush.msra.mxu3 %v460_v35  ;;  %489 = vmatpush.msra.mxu1 %v460_v35 }
  0xa7   : > { %767 = vmatpush.msra.mxu3 %v459_v36  ;;  %490 = vmatpush.msra.mxu1 %v459_v36 }
  0xac   : > { %447 = vmatmul.f32.gmra.mxu2 %v401_v32  ;;  %441 = vmatmul.f32.gmra.mxu0 %v399_v33 }
 0x121   : > { %v439_v38 = vpop.f32.mrf.mxu0 }
 0x122   : > { %v440_v39 = vadd.f32 %v877_v37, %v439_v38 }
 0x124   : > { %v451_v40 = vmax.f32 %v440_v39, 0.0 }
 0x126   : > { %491 = vmatmul.f32.vlgmr.msra.gmra.mxu1 %v451_v40 }
 0x127   : > { %v445_v41 = vpop.f32.mrf.mxu2 }
 0x128   : > { %v446_v42 = vadd.f32 %v877_v37, %v445_v41 }
 0x129   : > { %v442_v43 = vpop.f32.mrf.mxu0 }
 0x12a   : > { %v453_v44 = vmax.f32 %v446_v42, 0.0  ;;  %v443_v45 = vadd.f32 %v877_v37, %v442_v43 }
 0x12c   : > { %497 = vmatmul.f32.vlgmr.msra.gmra.mxu3 %v453_v44  ;;  %v452_v46 = vmax.f32 %v443_v45, 0.0 }
 0x12e   : > { %494 = vmatmul.f32.gmra.mxu1 %v452_v46 }
 0x12f   : > { %v448_v47 = vpop.f32.mrf.mxu2 }
 0x130   : > { %v449_v48 = vadd.f32 %v877_v37, %v448_v47 }
 0x132   : > { %v454_v49 = vmax.f32 %v449_v48, 0.0 }
 0x134   : > { %500 = vmatmul.f32.gmra.mxu3 %v454_v49 }
 0x1a3   : > { %v492_v51 = vpop.f32.mrf.mxu1 }
 0x1a4   : > { %v504_v52 = vadd.f32 %v492_v51, %v455_v50 }
 0x1a6   : > { %508 = vst [vmem:[#allocation2 + $0x10] sm:$0xff] %v504_v52 }
 0x1ab   : > { %v495_v54 = vpop.f32.mrf.mxu1 }
 0x1ac   : > { %v505_v55 = vadd.f32 %v495_v54, %v456_v53 }
 0x1ae   : > { %509 = vst [vmem:[#allocation2] sm:$0xff] %v505_v55 }
 0x1af   : > { %v498_v57 = vpop.f32.mrf.mxu3 }
 0x1b0   : > { %v506_v58 = vadd.f32 %v498_v57, %v457_v56 }
 0x1b2   : > { %510 = vst [vmem:[#allocation2 + $0x18] sm:$0xff] %v506_v58 }
 0x1b6   : > { %515 = sbr.rel (%p723_p12) target bundleno = 453 (0x1c5), region = 64 }
 0x1b7   : > { %v501_v60 = vpop.f32.mrf.mxu3 }
 0x1b8   : > { %v507_v61 = vadd.f32 %v501_v60, %v458_v59 }
 0x1ba   : > { %511 = vst [vmem:[#allocation2 + $0x8] sm:$0xff] %v507_v61 }
 0x1bb   : > { %v516_v62 = vld [vmem:[#allocation2 + $0x10] sm:$0xff]  ;;  %v878_v63 = vld [vmem:[%s1595_s23] ss:$0 sm:$0xff]  ;;  %v518_v1 = vld [vmem:[#allocation2 + $0x18] sm:$0xff] }
 0x1bc   : > { %v517_v0 = vld [vmem:[#allocation2] sm:$0xff]  ;;  %v524_v3 = vadd.f32 %v878_v63, %v516_v62  ;;  %v526_v5 = vadd.f32 %v878_v63, %v518_v1 }
 0x1bd   : > { %v525_v4 = vadd.f32 %v878_v63, %v517_v0 }
 0x1be   : > { %528 = vst [vmem:[%s1420_s29] sm:$0xff] %v524_v3 }
 0x1bf   : > { %529 = vst [vmem:[%s1420_s29 + $0x8] sm:$0xff] %v525_v4 }
 0x1c0   : > { %530 = vst [vmem:[%s1420_s29 + $0x10] sm:$0xff] %v526_v5 }
 0x1c1   : > { %v519_v2 = vld [vmem:[#allocation2 + $0x8] sm:$0xff] }
 0x1c2   : > { %v527_v6 = vadd.f32 %v878_v63, %v519_v2 }
 0x1c4   : > { %531 = vst [vmem:[%s1420_s29 + $0x18] sm:$0xff] %v527_v6 }
 0x1c5 PF: > { %s533_s24 = scalar_lea.sflag [#allocation5], %s1391_s1  ;;  %539 = sbr.rel (!%p1307_p4) target bundleno = 495 (0x1ef), region = 68 }
 0x1c6   : > { %s1597_s5 = sld [smem:[#allocation19_spill]] (%p1307_p4) }
 0x1cc   : > { %s725_s8 = sshll.u32 %s1597_s5, 2 }
 0x1cd   : > { %s541_s0 = ssub.s32 15, %s725_s8 }
 0x1ce   : > { %p542_p13 = scmp.lt.s32.totalorder %s541_s0, 4 }
 0x1d0   : > { %s1624_s0 = smov (!%p542_p13, %s541_s0), 4 }
 0x1d1   : > { %s726_s15 = sshll.u32 %s1624_s0, 3 }
 0x1d2   : > { %s545_s9 = ssub.s32 32, %s726_s15 }
 0x1d3   : > { %s546_s25 = sshll.u32 %s545_s9, 4 }
 0x1d4   : > { %547 = vsyncadd %s533_s24, %s546_s25  ;;  %p1478_p5 = scmp.ne.s32.totalorder %s726_s15, 0  ;;  %s735_s20 = sshll.u32 %s1597_s5, 5 }
 0x1d5   : > { %s1599_s16 = sld [smem:[#allocation30_spill]]  ;;  %s552_s18 = sshll.u32 %s1420_s29, 4  ;;  %s1487_s18 = int_to_ptr.vmem [resolvable:$true] %s552_s18 }
 0x1d6   : > { %s730_s13 = sshll.u32 %s1624_s0, 7  ;;  %s1002_s12 = sshra.s32 %s1487_s18, 4  ;;  %s1003_s12 = int_to_ptr.vmem [resolvable:$true] %s1002_s12 }
 0x1d7   : > { %s1004_s6 = sshrl.u32 %s730_s13, 4  ;;  %s1152_s17 = smov [#allocation11]  }
 0x1d8   : > { %s1009_s21 = scalar_lea.vmem %s1003_s12, %s1004_s6  ;;  %s1013_s11 = scalar_lea.vmem %s1152_s17, 64 }
 0x1d9   : > { %p1010_p4 = scmp.ne.s32.totalorder %s1003_s12, %s1009_s21  ;;  %p1015_p1 = scmp.lt.s32.totalorder %s1013_s11, %s1009_s21 }
 0x1db   : > { %s550_s7 = scalar_lea.hbm %s1599_s16, %s735_s20  ;;  %p1011_p8 = pnand %p1010_p4, %p1478_p5 }
 0x1dc   : > { %s554_s14 = sshll.u32 %s550_s7, 4  ;;  %s1489_s14 = int_to_ptr.hbm [resolvable:$true] %s554_s14 }
 0x1dd   : > { %p1012_p2 = pneg %p1011_p8 }
 0x1df   : > { %p1017_p6 = pnand %p1015_p1, %p1012_p2 }
 0x1e1   : > { %1020 = shalt.err (!%p1017_p6)
}
 0x1e2   : > { %s1021_s29 = sshra.s32 %s1489_s14, 4  ;;  %s1032_s8 = scalar_lea.hbm %s1599_s16, 120  ;;  %s1022_s29 = int_to_ptr.hbm [resolvable:$true] %s1021_s29 }
 0x1e3   : > { %s1028_s23 = scalar_lea.hbm %s1022_s29, %s1004_s6  ;;  %p1033_p0 = scmp.lt.s32.totalorder %s1022_s29, %s1599_s16 }
 0x1e4   : > { %p1029_p9 = scmp.ne.s32.totalorder %s1022_s29, %s1028_s23  ;;  %p1034_p7 = scmp.lt.s32.totalorder %s1032_s8, %s1028_s23 }
 0x1e6   : > { %p1030_p3 = pnand %p1029_p9, %p1478_p5  ;;  %p1035_p12 = por %p1034_p7, %p1033_p0 }
 0x1e8   : > { %p1031_p11 = pneg %p1030_p3 }
 0x1ea   : > { %p1036_p13 = pnand %p1035_p12, %p1031_p11 }
 0x1ec   : > { %1039 = shalt.err (!%p1036_p13)
}
 0x1ed   : > { %s1153_s25 = smov 128   ;;  %s1154_s20 = smov 8  }
 0x1ee   : > { %560 = dma.vmem_to_hbm [thread:$0]  (%p1478_p5), %s1487_s18, %s730_s13, %s1489_s14, %s533_s24, %s1153_s25, %s1153_s25, %s1154_s20  }
 0x1ef PF: > { %s1600_s10 = sld [smem:[#allocation17_spill]]  ;;  %p780_p4 = scmp.ge.s32.totalorder %s1143_s28, 2 }
 0x1f1   : > { %p777_p8 = pnand %p780_p4, %p1314_p10 }
 0x1f3   : > { %p778_p2 = pneg %p777_p8 }
 0x1f5   : > { %s569_s7 = sand.u32 1, %s1600_s10  }
 0x1f6   : > { %s570_s12 = scalar_lea.sflag [#allocation5], %s569_s7 }
 0x1f7   : > { %1098 = dma.done.wait (%p778_p2), %s570_s12, 512  }
 0x1f8   : > { %1100 = vsyncadd (%p778_p2), %s570_s12, 4294966784  ;;  %s27_s28 = sadd.s32 1, %s1143_s28   ;;  %s1602_s1 = sld [smem:[#allocation16_spill]] }
 0x1f9   : > { %p24_p1 = scmp.ge.s32.totalorder %s27_s28, 10   ;;  %s1603_s20 = sld [smem:[#allocation23_spill]] }
 0x1fa   : > { %s1604_s24 = sld [smem:[#allocation18_spill]]  ;;  %s1609_s18 = smov %s1107_s19 }
 0x1fb   : > { %s1605_s23 = sld [smem:[#allocation24_spill]]  ;;  %s1611_s21 = smov %s1119_s22 }
 0x1fc   : > { %s1606_s25 = sld [smem:[#allocation20_spill]] }
 0x1fd   : > { %s1607_s0 = sld [smem:[#allocation21_spill]] }
 0x1fe   : > { %s1608_s27 = sld [smem:[#allocation22_spill]]  ;;  %s1610_s19 = smov %s1602_s1 }
 0x1ff   :  { %26 = sbr.rel (!%p24_p1) target bundleno = 18 (0x12), region = 130 }
 0x200   : > { %s1612_s22 = smov %s1604_s24  ;;  %s1613_s24 = smov %s1135_s26 }
 0x203   : > { %s1614_s26 = smov %s1607_s0 }
 0x204   :  { %576 = vsyncpa [#allocation4], 1 }
 0x205   :  { %578 = vsyncpa [#allocation4 + $0x1], 1 }
 0x206   :  { %579 = vsyncpa [#allocation7], 1 }
 0x207   :  { %581 = vsyncpa [#allocation7 + $0x1], 1 }
 0x208   :  { %582 = vsyncpa [#allocation10], 1 }
 0x209   :  { %584 = vsyncpa [#allocation10 + $0x1], 1 }
 0x20a   :  { %585 = vsyncpa [#allocation5], 1 }
 0x20b   :  { %587 = vsyncpa [#allocation5 + $0x1], 1 }

</bundles_post_ra>
